<compile_context>
chip_gen: v5e
topology: v5e:2x2
jax: 0.10.0
libtpu: 0.0.40
codegen_flags: <defaults>
</compile_context>

<pallas_src>
import functools

import jax
import jax.numpy as jnp
from jax.experimental import pallas as pl
from jax.experimental.pallas import tpu as pltpu

_LANE = 128
_DEFAULT_SCOPED_VMEM = 32 << 20   # conservative default scoped-VMEM budget
_V7X_VMEM_CAP = 64 << 20          # smallest physical VMEM across v5e/v6e/v7x


def linear_kernel(x_ref, w_ref, b_ref, o_ref):
    # x_ref: [TM, K] f32, w_ref: [K, Npad] f32|bf16 (MXU-natural RHS layout),
    # b_ref: [1, Npad] f32, o_ref: [TM, Npad] f32 (lane-dense stores).
    x = x_ref[...]
    if x.dtype != w_ref.dtype:
        x = x.astype(w_ref.dtype)  # bf16 MXU operands on v6e/v7x (static branch)
    acc = jnp.dot(x, w_ref[...], preferred_element_type=jnp.float32)
    o_ref[...] = acc + b_ref[...]  # f32 epilogue (no bf16 VPU needed on v5e)


def prepare_linear_params(weight, bias, mxu_dtype=jnp.float32):
    """One-time layout prep (module init, NOT per forward call).

    weight: [N, K] float32 (PyTorch nn.Linear layout)
    bias:   [N]    float32
    Returns (w_kn [K, Npad] mxu_dtype, bias2d [1, Npad] f32).
    Pre-transposes to the MXU-natural [K, N] RHS layout and zero-pads N to a
    lane-dense multiple of 128 so the kernel's stores are unmasked.
    """
    n, k = weight.shape
    n_pad = max(_LANE, ((n + _LANE - 1) // _LANE) * _LANE)
    w_kn = jnp.zeros((k, n_pad), dtype=mxu_dtype)
    w_kn = w_kn.at[:, :n].set(weight.T.astype(mxu_dtype))
    b2d = jnp.zeros((1, n_pad), dtype=jnp.float32)
    b2d = b2d.at[0, :n].set(bias.astype(jnp.float32))
    return w_kn, b2d


def _batch_tile(b):
    # Large-to-small MXU/sublane-friendly row tiles so moderate batches still
    # produce >=2 grid steps (megacore sharding on v7x).
    for tm in (512, 256, 128, 64, 32, 16, 8):
        if b % tm == 0:
            return tm
    # Fallback: whole batch in one block (block == full dim is always legal);
    # VMEM footprint is guarded below via vmem_limit_bytes.
    return b


def linear_net_forward(x, w_kn, b2d, *, num_outputs):
    """Pallas equivalent of LinearNet.forward.

    x:     [B, ...] float32 (flattened like torch .view(B, -1))
    w_kn:  [K, Npad] from prepare_linear_params
    b2d:   [1, Npad] from prepare_linear_params
    returns [B, num_outputs] float32
    """
    B = x.shape[0]
    x_flat = x.reshape(B, -1)
    K, n_pad = w_kn.shape
    assert x_flat.shape[1] == K, (x_flat.shape, w_kn.shape)

    TM = _batch_tile(B)
    grid = (B // TM,)

    # Double-buffered VMEM footprint (x, weight, bias, out) with headroom;
    # only matters for the whole-batch fallback at very large B (v7x 64 MiB).
    w_bytes = jnp.dtype(w_kn.dtype).itemsize
    vmem_needed = (2 * TM * K * 4
                   + 2 * K * n_pad * w_bytes
                   + 2 * n_pad * 4
                   + 2 * TM * n_pad * 4)
    vmem_limit = min(max(_DEFAULT_SCOPED_VMEM, int(vmem_needed * 1.25)),
                     _V7X_VMEM_CAP)

    y_pad = pl.pallas_call(
        linear_kernel,
        out_shape=jax.ShapeDtypeStruct((B, n_pad), jnp.float32),
        grid=grid,
        in_specs=[
            pl.BlockSpec((TM, K), lambda i: (i, 0)),      # x rows, tiled over batch
            pl.BlockSpec((K, n_pad), lambda i: (0, 0)),   # weight, resident
            pl.BlockSpec((1, n_pad), lambda i: (0, 0)),   # bias, resident
        ],
        out_specs=pl.BlockSpec((TM, n_pad), lambda i: (i, 0)),  # lane-dense stores
        compiler_params=pltpu.CompilerParams(
            dimension_semantics=("parallel",),  # shard batch tiles across TCs (v7x)
            vmem_limit_bytes=vmem_limit,
        ),
    )(x_flat, w_kn, b2d)

    return y_pad[:, :num_outputs]


if __name__ == "__main__":
    # Shapes consistent with the module: x is NCHW [2, 4, 16, 16]
    # -> num_inputs = 4*16*16 = 1024, num_outputs = 32.
    B, C, H, W = 2, 4, 16, 16
    num_inputs = C * H * W
    num_outputs = 32

    key = jax.random.PRNGKey(0)
    kx, kw, kb = jax.random.split(key, 3)

    x = jax.random.normal(kx, (B, C, H, W), dtype=jnp.float32)

    # Deterministic init mimicking nn.Linear default: U(-1/sqrt(K), 1/sqrt(K)).
    bound = 1.0 / jnp.sqrt(jnp.float32(num_inputs))
    weight = jax.random.uniform(
        kw, (num_outputs, num_inputs), dtype=jnp.float32, minval=-bound, maxval=bound
    )
    bias = jax.random.uniform(
        kb, (num_outputs,), dtype=jnp.float32, minval=-bound, maxval=bound
    )

    # Plain-JAX reference (matches PyTorch forward semantics).
    y_ref = x.reshape(B, -1) @ weight.T + bias

    forward = jax.jit(functools.partial(linear_net_forward, num_outputs=num_outputs))

    # f32 MXU-operand path: matches module semantics within tight tolerance.
    w32, b32 = prepare_linear_params(weight, bias, mxu_dtype=jnp.float32)
    y32 = forward(x, w32, b32)
    jax.block_until_ready(y32)
    assert y32.shape == (B, num_outputs)
    assert jnp.allclose(y32, y_ref, atol=1e-4, rtol=1e-4)

    # bf16 MXU-operand path (halves weight DMA on v6e/v7x; f32 accumulate &
    # epilogue). K=1024 contraction -> relaxed tolerance vs. f32 reference.
    wbf, bbf = prepare_linear_params(weight, bias, mxu_dtype=jnp.bfloat16)
    ybf = forward(x, wbf, bbf)
    jax.block_until_ready(ybf)
    assert ybf.shape == (B, num_outputs)
    assert jnp.allclose(ybf, y_ref, atol=2e-2, rtol=2e-2)

    print("KERNEL_OK")
</pallas_src>

<mosaic_0001>
module attributes {stable_mosaic.version = 11 : i64} {
  func.func @linear_kernel(%arg0: i32, %arg1: memref<2x1024xf32, #tpu.memory_space<vmem>>, %arg2: memref<1024x128xf32, #tpu.memory_space<vmem>>, %arg3: memref<1x128xf32, #tpu.memory_space<vmem>>, %arg4: memref<2x128xf32, #tpu.memory_space<vmem>>) attributes {dimension_semantics = [#tpu.dimension_semantics<parallel>], iteration_bounds = array<i64: 1>, scalar_prefetch = 0 : i64, scratch_operands = 0 : i64, tpu.core_type = #tpu.core_type<tc>, window_params = [{transform_indices = @transform_0, window_bounds = array<i64: 2, 1024>}, {pipeline_mode = #tpu.pipeline_mode<synchronous>, transform_indices = @transform_1, window_bounds = array<i64: 1024, 128>}, {pipeline_mode = #tpu.pipeline_mode<synchronous>, transform_indices = @transform_2, window_bounds = array<i64: 1, 128>}, {transform_indices = @transform_3, window_bounds = array<i64: 2, 128>}]} {
    %c0 = arith.constant 0 : index
    %c0_0 = arith.constant 0 : index
    %0 = vector.load %arg1[%c0, %c0_0] : memref<2x1024xf32, #tpu.memory_space<vmem>>, vector<2x1024xf32>
    %c0_1 = arith.constant 0 : index
    %c0_2 = arith.constant 0 : index
    %1 = vector.load %arg2[%c0_1, %c0_2] : memref<1024x128xf32, #tpu.memory_space<vmem>>, vector<1024x128xf32>
    %cst = arith.constant dense<0.000000e+00> : vector<2x128xf32>
    %2 = tpu.matmul %0, %1, %cst {dimension_numbers = #tpu.dot_dimension_numbers<[1], [0], [0], [1], [0, 0, 1, 1], [], []>} : vector<2x1024xf32>, vector<1024x128xf32>, vector<2x128xf32> -> vector<2x128xf32>
    %c0_3 = arith.constant 0 : index
    %c0_4 = arith.constant 0 : index
    %3 = vector.load %arg3[%c0_3, %c0_4] : memref<1x128xf32, #tpu.memory_space<vmem>>, vector<1x128xf32>
    %4 = vector.broadcast %3 : vector<1x128xf32> to vector<2x128xf32>
    %5 = arith.addf %2, %4 : vector<2x128xf32>
    %c0_5 = arith.constant 0 : index
    %c0_6 = arith.constant 0 : index
    %6 = vector.load %arg4[%c0_5, %c0_6] : memref<2x128xf32, #tpu.memory_space<vmem>>, vector<2x128xf32>
    tpu.vector_store %arg4[%c0_5, %c0_6], %5 {strides = array<i32>} : memref<2x128xf32, #tpu.memory_space<vmem>>, vector<2x128xf32>,
    return
  }
  func.func @transform_0(%arg0: i32) -> (i32, i32) {
    %c0_i32 = arith.constant 0 : i32
    %c0_i32_0 = arith.constant 0 : i32
    return %arg0, %c0_i32 : i32, i32
  }
  func.func @transform_1(%arg0: i32) -> (i32, i32) {
    %c0_i32 = arith.constant 0 : i32
    %c0_i32_0 = arith.constant 0 : i32
    %c0_i32_1 = arith.constant 0 : i32
    return %c0_i32, %c0_i32_0 : i32, i32
  }
  func.func @transform_2(%arg0: i32) -> (i32, i32) {
    %c0_i32 = arith.constant 0 : i32
    %c0_i32_0 = arith.constant 0 : i32
    %c0_i32_1 = arith.constant 0 : i32
    return %c0_i32, %c0_i32_0 : i32, i32
  }
  func.func @transform_3(%arg0: i32) -> (i32, i32) {
    %c0_i32 = arith.constant 0 : i32
    %c0_i32_0 = arith.constant 0 : i32
    return %arg0, %c0_i32 : i32, i32
  }
}

</mosaic_0001>

<bundles_post_ra>
// kernel: linear_net_forward.1
= control target key start
LH: loop header
LB: loop body
LE: loop exit
PB: predicated region body
PF: predicated region fallthrough
CT: control target
= control target key end

     0   :  { %8 = vsyncpa [#allocation3], 0  ;;  %s460_s0 = inlined_call_operand.vmem [shape: f32[2,1024], index: 0, kind: input, shape index: {}]   ;;  %s461_s1 = inlined_call_operand.hbm [shape: f32[1024,128], index: 1, kind: input, shape index: {}]   ;;  %s462_s2 = inlined_call_operand.vmem [shape: f32[1,128], index: 2, kind: input, shape index: {}]   ;;  %s463_s3 = inlined_call_operand.hbm [shape: f32[2,128], index: 3, kind: output, shape index: {}]  }
   0x1   :  { %9 = vsyncpa [#allocation4], 0  ;;  %s16_s14 = sshll.u32 %s461_s1, 4  ;;  %s421_s15 = smov [#allocation2]   ;;  %s17_s14 = int_to_ptr.hbm [resolvable:$true] %s16_s14 }
   0x2   :  { %s18_s16 = sshll.u32 %s421_s15, 4  ;;  %s422_s17 = smov 128   ;;  %s19_s16 = int_to_ptr.vmem [resolvable:$true] %s18_s16 }
   0x3   :  { %s423_s18 = smov 8  }
   0x4   :  { %24 = dma.hbm_to_vmem [thread:$0]  %s17_s14, 16384, %s19_s16, [#allocation3], %s422_s17, %s422_s17, %s423_s18  }
   0x5   :  { %417 = dma.done.wait [#allocation3], 16384  }
   0x6   :  { %418 = vsyncadd [#allocation3], 4294950912  ;;  %v80_v0 = vld [vmem:[#allocation2 + $0x178] sm:$0xff]  ;;  %v79_v2 = vld [vmem:[#allocation2 + $0x170] sm:$0xff]  ;;  %s424_s23 = smov [#allocation5]   ;;  %s354_s27 = sshll.u32 %s463_s3, 4  ;;  %s355_s27 = int_to_ptr.hbm [resolvable:$true] %s354_s27 }
   0x7   :  { %v48_v1 = vld [vmem:[#allocation2 + $0x78] sm:$0xff]  ;;  %226 = vmatpush.msra.mxu2 %v80_v0  ;;  %v47_v4 = vld [vmem:[#allocation2 + $0x70] sm:$0xff]  ;;  %v78_v6 = vld [vmem:[#allocation2 + $0x168] sm:$0xff]  ;;  %s352_s24 = sshll.u32 %s424_s23, 4  ;;  %s353_s24 = int_to_ptr.vmem [resolvable:$true] %s352_s24 }
   0x8   :  { %186 = vmatpush.msra.mxu0 %v48_v1  ;;  %v96_v3 = vld [vmem:[#allocation2 + $0x1f8] sm:$0xff]  ;;  %v95_v7 = vld [vmem:[#allocation2 + $0x1f0] sm:$0xff]  ;;  %v46_v8 = vld [vmem:[#allocation2 + $0x68] sm:$0xff] }
   0x9   :  { %v64_v5 = vld [vmem:[#allocation2 + $0xf8] sm:$0xff]  ;;  %246 = vmatpush.msra.mxu3 %v96_v3  ;;  %227 = vmatpush.msra.mxu2 %v79_v2  ;;  %v63_v9 = vld [vmem:[#allocation2 + $0xf0] sm:$0xff]  ;;  %v94_v10 = vld [vmem:[#allocation2 + $0x1e8] sm:$0xff] }
   0xa   :  { %206 = vmatpush.msra.mxu1 %v64_v5  ;;  %187 = vmatpush.msra.mxu0 %v47_v4  ;;  %v77_v11 = vld [vmem:[#allocation2 + $0x160] sm:$0xff]  ;;  %v62_v13 = vld [vmem:[#allocation2 + $0xe8] sm:$0xff]  ;;  %v76_v16 = vld [vmem:[#allocation2 + $0x158] sm:$0xff] }
   0xb   :  { %247 = vmatpush.msra.mxu3 %v95_v7  ;;  %v45_v12 = vld [vmem:[#allocation2 + $0x60] sm:$0xff]  ;;  %228 = vmatpush.msra.mxu2 %v78_v6  ;;  %v44_v17 = vld [vmem:[#allocation2 + $0x58] sm:$0xff]  ;;  %v75_v20 = vld [vmem:[#allocation2 + $0x150] sm:$0xff] }
   0xc   :  { %207 = vmatpush.msra.mxu1 %v63_v9  ;;  %188 = vmatpush.msra.mxu0 %v46_v8  ;;  %v93_v14 = vld [vmem:[#allocation2 + $0x1e0] sm:$0xff]  ;;  %v92_v18 = vld [vmem:[#allocation2 + $0x1d8] sm:$0xff]  ;;  %v43_v21 = vld [vmem:[#allocation2 + $0x50] sm:$0xff] }
   0xd   :  { %v61_v15 = vld [vmem:[#allocation2 + $0xe0] sm:$0xff]  ;;  %248 = vmatpush.msra.mxu3 %v94_v10  ;;  %229 = vmatpush.msra.mxu2 %v77_v11  ;;  %v60_v19 = vld [vmem:[#allocation2 + $0xd8] sm:$0xff]  ;;  %v91_v22 = vld [vmem:[#allocation2 + $0x1d0] sm:$0xff] }
   0xe   :  { %208 = vmatpush.msra.mxu1 %v62_v13  ;;  %189 = vmatpush.msra.mxu0 %v45_v12  ;;  %v59_v23 = vld [vmem:[#allocation2 + $0xd0] sm:$0xff]  ;;  %v74_v24 = vld [vmem:[#allocation2 + $0x148] sm:$0xff]  ;;  %v73_v28 = vld [vmem:[#allocation2 + $0x140] sm:$0xff] }
   0xf   :  { %249 = vmatpush.msra.mxu3 %v93_v14  ;;  %230 = vmatpush.msra.mxu2 %v76_v16  ;;  %v42_v25 = vld [vmem:[#allocation2 + $0x48] sm:$0xff]  ;;  %v41_v29 = vld [vmem:[#allocation2 + $0x40] sm:$0xff]  ;;  %v72_v32 = vld [vmem:[#allocation2 + $0x138] sm:$0xff] }
  0x10   :  { %209 = vmatpush.msra.mxu1 %v61_v15  ;;  %190 = vmatpush.msra.mxu0 %v44_v17  ;;  %v90_v26 = vld [vmem:[#allocation2 + $0x1c8] sm:$0xff]  ;;  %v89_v30 = vld [vmem:[#allocation2 + $0x1c0] sm:$0xff]  ;;  %v40_v33 = vld [vmem:[#allocation2 + $0x38] sm:$0xff] }
  0x11   :  { %250 = vmatpush.msra.mxu3 %v92_v18  ;;  %231 = vmatpush.msra.mxu2 %v75_v20  ;;  %v58_v27 = vld [vmem:[#allocation2 + $0xc8] sm:$0xff]  ;;  %v57_v31 = vld [vmem:[#allocation2 + $0xc0] sm:$0xff]  ;;  %v88_v34 = vld [vmem:[#allocation2 + $0x1b8] sm:$0xff] }
  0x12   :  { %210 = vmatpush.msra.mxu1 %v60_v19  ;;  %191 = vmatpush.msra.mxu0 %v43_v21  ;;  %v56_v35 = vld [vmem:[#allocation2 + $0xb8] sm:$0xff]  ;;  %v71_v36 = vld [vmem:[#allocation2 + $0x130] sm:$0xff]  ;;  %v70_v40 = vld [vmem:[#allocation2 + $0x128] sm:$0xff] }
  0x13   :  { %251 = vmatpush.msra.mxu3 %v91_v22  ;;  %232 = vmatpush.msra.mxu2 %v74_v24  ;;  %v39_v37 = vld [vmem:[#allocation2 + $0x30] sm:$0xff]  ;;  %v38_v41 = vld [vmem:[#allocation2 + $0x28] sm:$0xff]  ;;  %v69_v44 = vld [vmem:[#allocation2 + $0x120] sm:$0xff] }
  0x14   :  { %211 = vmatpush.msra.mxu1 %v59_v23  ;;  %192 = vmatpush.msra.mxu0 %v42_v25  ;;  %v87_v38 = vld [vmem:[#allocation2 + $0x1b0] sm:$0xff]  ;;  %v86_v42 = vld [vmem:[#allocation2 + $0x1a8] sm:$0xff]  ;;  %v37_v45 = vld [vmem:[#allocation2 + $0x20] sm:$0xff] }
  0x15   :  { %252 = vmatpush.msra.mxu3 %v90_v26  ;;  %233 = vmatpush.msra.mxu2 %v73_v28  ;;  %v55_v39 = vld [vmem:[#allocation2 + $0xb0] sm:$0xff]  ;;  %v54_v43 = vld [vmem:[#allocation2 + $0xa8] sm:$0xff]  ;;  %v85_v46 = vld [vmem:[#allocation2 + $0x1a0] sm:$0xff] }
  0x16   :  { %212 = vmatpush.msra.mxu1 %v58_v27  ;;  %193 = vmatpush.msra.mxu0 %v41_v29  ;;  %v53_v47 = vld [vmem:[#allocation2 + $0xa0] sm:$0xff]  ;;  %v68_v48 = vld [vmem:[#allocation2 + $0x118] sm:$0xff]  ;;  %v67_v52 = vld [vmem:[#allocation2 + $0x110] sm:$0xff] }
  0x17   :  { %253 = vmatpush.msra.mxu3 %v89_v30  ;;  %234 = vmatpush.msra.mxu2 %v72_v32  ;;  %v36_v49 = vld [vmem:[#allocation2 + $0x18] sm:$0xff]  ;;  %v35_v53 = vld [vmem:[#allocation2 + $0x10] sm:$0xff]  ;;  %v66_v56 = vld [vmem:[#allocation2 + $0x108] sm:$0xff] }
  0x18   :  { %213 = vmatpush.msra.mxu1 %v57_v31  ;;  %194 = vmatpush.msra.mxu0 %v40_v33  ;;  %v84_v50 = vld [vmem:[#allocation2 + $0x198] sm:$0xff]  ;;  %v83_v54 = vld [vmem:[#allocation2 + $0x190] sm:$0xff]  ;;  %v34_v57 = vld [vmem:[#allocation2 + $0x8] sm:$0xff] }
  0x19   :  { %254 = vmatpush.msra.mxu3 %v88_v34  ;;  %235 = vmatpush.msra.mxu2 %v71_v36  ;;  %v52_v51 = vld [vmem:[#allocation2 + $0x98] sm:$0xff]  ;;  %v51_v55 = vld [vmem:[#allocation2 + $0x90] sm:$0xff]  ;;  %v82_v58 = vld [vmem:[#allocation2 + $0x188] sm:$0xff] }
  0x1a   :  { %214 = vmatpush.msra.mxu1 %v56_v35  ;;  %195 = vmatpush.msra.mxu0 %v39_v37  ;;  %v50_v59 = vld [vmem:[#allocation2 + $0x88] sm:$0xff]  ;;  %v65_v60 = vld [vmem:[#allocation2 + $0x100] sm:$0xff]  ;;  %v144_v62 = vld [vmem:[#allocation2 + $0x378] sm:$0xff] }
  0x1b   :  { %255 = vmatpush.msra.mxu3 %v87_v38  ;;  %236 = vmatpush.msra.mxu2 %v70_v40  ;;  %v33_v61 = vld [vmem:[#allocation2] sm:$0xff]  ;;  %v112_v0 = vld [vmem:[#allocation2 + $0x278] sm:$0xff]  ;;  %v143_v2 = vld [vmem:[#allocation2 + $0x370] sm:$0xff] }
  0x1c   :  { %215 = vmatpush.msra.mxu1 %v55_v39  ;;  %196 = vmatpush.msra.mxu0 %v38_v41  ;;  %v81_v63 = vld [vmem:[#allocation2 + $0x180] sm:$0xff]  ;;  %v160_v1 = vld [vmem:[#allocation2 + $0x3f8] sm:$0xff]  ;;  %v111_v4 = vld [vmem:[#allocation2 + $0x270] sm:$0xff] }
  0x1d   :  { %256 = vmatpush.msra.mxu3 %v86_v42  ;;  %237 = vmatpush.msra.mxu2 %v69_v44  ;;  %v49_v3 = vld [vmem:[#allocation2 + $0x80] sm:$0xff]  ;;  %v128_v5 = vld [vmem:[#allocation2 + $0x2f8] sm:$0xff]  ;;  %v142_v6 = vld [vmem:[#allocation2 + $0x368] sm:$0xff] }
  0x1e   :  { %216 = vmatpush.msra.mxu1 %v54_v43  ;;  %197 = vmatpush.msra.mxu0 %v37_v45  ;;  %v159_v7 = vld [vmem:[#allocation2 + $0x3f0] sm:$0xff]  ;;  %v110_v8 = vld [vmem:[#allocation2 + $0x268] sm:$0xff]  ;;  %v141_v10 = vld [vmem:[#allocation2 + $0x360] sm:$0xff] }
  0x1f   :  { %257 = vmatpush.msra.mxu3 %v85_v46  ;;  %238 = vmatpush.msra.mxu2 %v68_v48  ;;  %v127_v9 = vld [vmem:[#allocation2 + $0x2f0] sm:$0xff]  ;;  %v158_v11 = vld [vmem:[#allocation2 + $0x3e8] sm:$0xff]  ;;  %v109_v12 = vld [vmem:[#allocation2 + $0x260] sm:$0xff] }
  0x20   :  { %217 = vmatpush.msra.mxu1 %v53_v47  ;;  %198 = vmatpush.msra.mxu0 %v36_v49  ;;  %v126_v13 = vld [vmem:[#allocation2 + $0x2e8] sm:$0xff]  ;;  %v31_v14 = vld [vmem:[%s460_s0] sm:$0xff]  ;;  %v157_v16 = vld [vmem:[#allocation2 + $0x3e0] sm:$0xff] }
  0x21   :  { %258 = vmatpush.msra.mxu3 %v84_v50  ;;  %239 = vmatpush.msra.mxu2 %v67_v52  ;;  %v140_v15 = vld [vmem:[#allocation2 + $0x358] sm:$0xff]  ;;  %167 = vst [vmem:[#allocation1] ss:$4 sm:$0xff] %v31_v14  ;;  %v125_v18 = vld [vmem:[#allocation2 + $0x2e0] sm:$0xff]  ;;  %v139_v19 = vld [vmem:[#allocation2 + $0x350] sm:$0xff] }
  0x22   :  { %218 = vmatpush.msra.mxu1 %v52_v51  ;;  %199 = vmatpush.msra.mxu0 %v35_v53  ;;  %v108_v17 = vld [vmem:[#allocation2 + $0x258] sm:$0xff]  ;;  %v107_v21 = vld [vmem:[#allocation2 + $0x250] sm:$0xff]  ;;  %v138_v23 = vld [vmem:[#allocation2 + $0x348] sm:$0xff] }
  0x23   :  { %259 = vmatpush.msra.mxu3 %v83_v54  ;;  %240 = vmatpush.msra.mxu2 %v66_v56  ;;  %v156_v20 = vld [vmem:[#allocation2 + $0x3d8] sm:$0xff]  ;;  %v155_v24 = vld [vmem:[#allocation2 + $0x3d0] sm:$0xff]  ;;  %v32_v25 = vld [vmem:[%s460_s0 + $0x8] sm:$0xff] }
  0x24   :  { %219 = vmatpush.msra.mxu1 %v51_v55  ;;  %200 = vmatpush.msra.mxu0 %v34_v57  ;;  %v124_v22 = vld [vmem:[#allocation2 + $0x2d8] sm:$0xff]  ;;  %v106_v26 = vld [vmem:[#allocation2 + $0x248] sm:$0xff]  ;;  %v123_v27 = vld [vmem:[#allocation2 + $0x2d0] sm:$0xff]  ;;  %169 = vst [vmem:[#allocation1 + $0x20] ss:$4 sm:$0xff] %v32_v25 }
  0x25   :  { %260 = vmatpush.msra.mxu3 %v82_v58  ;;  %241 = vmatpush.msra.mxu2 %v65_v60  ;;  %v137_v28 = vld [vmem:[#allocation2 + $0x340] sm:$0xff]  ;;  %v154_v29 = vld [vmem:[#allocation2 + $0x3c8] sm:$0xff]  ;;  %v136_v32 = vld [vmem:[#allocation2 + $0x338] sm:$0xff] }
  0x26   :  { %220 = vmatpush.msra.mxu1 %v50_v59  ;;  %201 = vmatpush.msra.mxu0 %v33_v61  ;;  %v105_v30 = vld [vmem:[#allocation2 + $0x240] sm:$0xff]  ;;  %v122_v31 = vld [vmem:[#allocation2 + $0x2c8] sm:$0xff]  ;;  %v104_v34 = vld [vmem:[#allocation2 + $0x238] sm:$0xff] }
  0x27   :  { %306 = vmatpush.msrb.mxu2 %v144_v62  ;;  %261 = vmatpush.msra.mxu3 %v81_v63  ;;  %v153_v33 = vld [vmem:[#allocation2 + $0x3c0] sm:$0xff]  ;;  %v135_v36 = vld [vmem:[#allocation2 + $0x330] sm:$0xff]  ;;  %v152_v37 = vld [vmem:[#allocation2 + $0x3b8] sm:$0xff] }
  0x28   :  { %266 = vmatpush.msrb.mxu0 %v112_v0  ;;  %221 = vmatpush.msra.mxu1 %v49_v3  ;;  %v121_v35 = vld [vmem:[#allocation2 + $0x2c0] sm:$0xff]  ;;  %v103_v38 = vld [vmem:[#allocation2 + $0x230] sm:$0xff]  ;;  %v120_v39 = vld [vmem:[#allocation2 + $0x2b8] sm:$0xff] }
  0x29   :  { %326 = vmatpush.msrb.mxu3 %v160_v1  ;;  %307 = vmatpush.msrb.mxu2 %v143_v2  ;;  %v134_v40 = vld [vmem:[#allocation2 + $0x328] sm:$0xff]  ;;  %v151_v41 = vld [vmem:[#allocation2 + $0x3b0] sm:$0xff]  ;;  %v133_v44 = vld [vmem:[#allocation2 + $0x320] sm:$0xff] }
  0x2a   :  { %267 = vmatpush.msrb.mxu0 %v111_v4  ;;  %286 = vmatpush.msrb.mxu1 %v128_v5  ;;  %v102_v42 = vld [vmem:[#allocation2 + $0x228] sm:$0xff]  ;;  %v119_v43 = vld [vmem:[#allocation2 + $0x2b0] sm:$0xff]  ;;  %v101_v47 = vld [vmem:[#allocation2 + $0x220] sm:$0xff] }
  0x2b   :  { %308 = vmatpush.msrb.mxu2 %v142_v6  ;;  %327 = vmatpush.msrb.mxu3 %v159_v7  ;;  %v150_v45 = vld [vmem:[#allocation2 + $0x3a8] sm:$0xff]  ;;  %v132_v49 = vld [vmem:[#allocation2 + $0x318] sm:$0xff]  ;;  %v149_v50 = vld [vmem:[#allocation2 + $0x3a0] sm:$0xff] }
  0x2c   :  { %268 = vmatpush.msrb.mxu0 %v110_v8  ;;  %287 = vmatpush.msrb.mxu1 %v127_v9  ;;  %v172_v46 = vld.sshfl [vmem:[#allocation1 + $0x10] sm:$0xff pattern:$0x73625140]  ;;  %v170_v51 = vld.sshfl [vmem:[#allocation1] sm:$0xff pattern:$0x73625140] }
  0x2d   :  { %309 = vmatpush.msrb.mxu2 %v141_v10  ;;  %328 = vmatpush.msrb.mxu3 %v158_v11  ;;  %v118_v48 = vld [vmem:[#allocation2 + $0x2a8] sm:$0xff]  ;;  %v173_v52 = vld.sshfl [vmem:[#allocation1 + $0x18] sm:$0xff pattern:$0x73625140]  ;;  %v100_v53 = vld [vmem:[#allocation2 + $0x218] sm:$0xff] }
  0x2e   :  { %269 = vmatpush.msrb.mxu0 %v109_v12  ;;  %288 = vmatpush.msrb.mxu1 %v126_v13  ;;  %v117_v54 = vld [vmem:[#allocation2 + $0x2a0] sm:$0xff]  ;;  %v131_v55 = vld [vmem:[#allocation2 + $0x310] sm:$0xff]  ;;  %v148_v56 = vld [vmem:[#allocation2 + $0x398] sm:$0xff] }
  0x2f   :  { %310 = vmatpush.msrb.mxu2 %v140_v15  ;;  %329 = vmatpush.msrb.mxu3 %v157_v16  ;;  %v171_v57 = vld.sshfl [vmem:[#allocation1 + $0x8] sm:$0xff pattern:$0x73625140]  ;;  %v99_v58 = vld [vmem:[#allocation2 + $0x210] sm:$0xff]  ;;  %v116_v59 = vld [vmem:[#allocation2 + $0x298] sm:$0xff] }
  0x30   :  { %270 = vmatpush.msrb.mxu0 %v108_v17  ;;  %289 = vmatpush.msrb.mxu1 %v125_v18  ;;  %v130_v60 = vld [vmem:[#allocation2 + $0x308] sm:$0xff]  ;;  %v147_v61 = vld [vmem:[#allocation2 + $0x390] sm:$0xff]  ;;  %v129_v0 = vld [vmem:[#allocation2 + $0x300] sm:$0xff] }
  0x31   :  { %311 = vmatpush.msrb.mxu2 %v139_v19  ;;  %330 = vmatpush.msrb.mxu3 %v156_v20  ;;  %v98_v62 = vld [vmem:[#allocation2 + $0x208] sm:$0xff]  ;;  %v115_v63 = vld [vmem:[#allocation2 + $0x290] sm:$0xff]  ;;  %v97_v3 = vld [vmem:[#allocation2 + $0x200] sm:$0xff] }
  0x32   :  { %271 = vmatpush.msrb.mxu0 %v107_v21  ;;  %290 = vmatpush.msrb.mxu1 %v124_v22  ;;  %v146_v1 = vld [vmem:[#allocation2 + $0x388] sm:$0xff]  ;;  %v145_v5 = vld [vmem:[#allocation2 + $0x380] sm:$0xff]  ;;  %v174_v6 = vld.sshfl [vmem:[#allocation1 + $0x20] sm:$0xff pattern:$0x73625140] }
  0x33   :  { %312 = vmatpush.msrb.mxu2 %v138_v23  ;;  %331 = vmatpush.msrb.mxu3 %v155_v24  ;;  %v176_v2 = vld.sshfl [vmem:[#allocation1 + $0x30] sm:$0xff pattern:$0x73625140]  ;;  %v177_v7 = vld.sshfl [vmem:[#allocation1 + $0x38] sm:$0xff pattern:$0x73625140] }
  0x34   :  { %272 = vmatpush.msrb.mxu0 %v106_v26  ;;  %291 = vmatpush.msrb.mxu1 %v123_v27  ;;  %v114_v4 = vld [vmem:[#allocation2 + $0x288] sm:$0xff]  ;;  %v113_v8 = vld [vmem:[#allocation2 + $0x280] sm:$0xff]  ;;  %v368_v10 = vld [vmem:[%s462_s2] ss:$0 sm:$0xff] }
  0x35   :  { %313 = vmatpush.msrb.mxu2 %v137_v28  ;;  %332 = vmatpush.msrb.mxu3 %v154_v29  ;;  %v175_v9 = vld.sshfl [vmem:[#allocation1 + $0x28] sm:$0xff pattern:$0x73625140] }
  0x36   :  { %273 = vmatpush.msrb.mxu0 %v105_v30  ;;  %292 = vmatpush.msrb.mxu1 %v122_v31 }
  0x37   :  { %314 = vmatpush.msrb.mxu2 %v136_v32  ;;  %333 = vmatpush.msrb.mxu3 %v153_v33 }
  0x38   :  { %274 = vmatpush.msrb.mxu0 %v104_v34  ;;  %293 = vmatpush.msrb.mxu1 %v121_v35 }
  0x39   :  { %315 = vmatpush.msrb.mxu2 %v135_v36  ;;  %334 = vmatpush.msrb.mxu3 %v152_v37 }
  0x3a   :  { %275 = vmatpush.msrb.mxu0 %v103_v38  ;;  %294 = vmatpush.msrb.mxu1 %v120_v39 }
  0x3b   :  { %316 = vmatpush.msrb.mxu2 %v134_v40  ;;  %335 = vmatpush.msrb.mxu3 %v151_v41 }
  0x3c   :  { %276 = vmatpush.msrb.mxu0 %v102_v42  ;;  %295 = vmatpush.msrb.mxu1 %v119_v43 }
  0x3d   :  { %317 = vmatpush.msrb.mxu2 %v133_v44  ;;  %336 = vmatpush.msrb.mxu3 %v150_v45 }
  0x3e   :  { %242 = vmatmul.f32.vlgmr.msra.gmra.mxu2 %v172_v46  ;;  %277 = vmatpush.msrb.mxu0 %v101_v47 }
  0x3f   :  { %296 = vmatpush.msrb.mxu1 %v118_v48  ;;  %318 = vmatpush.msrb.mxu2 %v132_v49 }
  0x40   :  { %337 = vmatpush.msrb.mxu3 %v149_v50  ;;  %202 = vmatmul.f32.vlgmr.msra.gmra.mxu0 %v170_v51 }
  0x41   :  { %262 = vmatmul.f32.vlgmr.msra.gmra.mxu3 %v173_v52  ;;  %278 = vmatpush.msrb.mxu0 %v100_v53 }
  0x42   :  { %297 = vmatpush.msrb.mxu1 %v117_v54  ;;  %319 = vmatpush.msrb.mxu2 %v131_v55 }
  0x43   :  { %338 = vmatpush.msrb.mxu3 %v148_v56  ;;  %222 = vmatmul.f32.vlgmr.msra.gmra.mxu1 %v171_v57 }
  0x44   :  { %279 = vmatpush.msrb.mxu0 %v99_v58  ;;  %298 = vmatpush.msrb.mxu1 %v116_v59 }
  0x45   :  { %320 = vmatpush.msrb.mxu2 %v130_v60  ;;  %339 = vmatpush.msrb.mxu3 %v147_v61 }
  0x46   :  { %280 = vmatpush.msrb.mxu0 %v98_v62  ;;  %299 = vmatpush.msrb.mxu1 %v115_v63 }
  0x47   :  { %321 = vmatpush.msrb.mxu2 %v129_v0  ;;  %340 = vmatpush.msrb.mxu3 %v146_v1 }
  0x48   :  { %322 = vmatmul.f32.vlgmr.msrb.gmra.mxu2 %v176_v2  ;;  %281 = vmatpush.msrb.mxu0 %v97_v3 }
  0x49   :  { %300 = vmatpush.msrb.mxu1 %v114_v4  ;;  %341 = vmatpush.msrb.mxu3 %v145_v5 }
  0x4a   :  { %282 = vmatmul.f32.vlgmr.msrb.gmra.mxu0 %v174_v6  ;;  %342 = vmatmul.f32.vlgmr.msrb.gmra.mxu3 %v177_v7 }
  0x4b   :  { %301 = vmatpush.msrb.mxu1 %v113_v8 }
  0x4c   :  { %302 = vmatmul.f32.vlgmr.msrb.gmra.mxu1 %v175_v9 }
  0xbd   :  { %v203_v11 = vpop.f32.mrf.mxu0 }
  0xbe   :  { %v204_v12 = vadd.f32 %v368_v10, %v203_v11 }
  0xc0   :  { %v223_v13 = vpop.f32.mrf.mxu1 }
  0xc1   :  { %v224_v14 = vadd.f32 %v223_v13, %v204_v12  ;;  %v243_v15 = vpop.f32.mrf.mxu2 }
  0xc3   :  { %v244_v16 = vadd.f32 %v243_v15, %v224_v14 }
  0xc4   :  { %v263_v17 = vpop.f32.mrf.mxu3 }
  0xc5   :  { %v264_v18 = vadd.f32 %v263_v17, %v244_v16 }
  0xc7   :  { %v283_v19 = vpop.f32.mrf.mxu0 }
  0xc8   :  { %v284_v20 = vadd.f32 %v283_v19, %v264_v18 }
  0xc9   :  { %v303_v21 = vpop.f32.mrf.mxu1 }
  0xca   :  { %v304_v22 = vadd.f32 %v303_v21, %v284_v20 }
  0xcb   :  { %v323_v23 = vpop.f32.mrf.mxu2 }
  0xcc   :  { %v324_v24 = vadd.f32 %v323_v23, %v304_v22 }
  0xcd   :  { %v343_v25 = vpop.f32.mrf.mxu3 }
  0xce   :  { %v344_v26 = vadd.f32 %v343_v25, %v324_v24 }
  0xd0   :  { %346 = vst [vmem:[#allocation5] sm:$0x3] %v344_v26 }
  0xd1   :  { %357 = dma.vmem_to_hbm [thread:$0]  %s353_s24, 32, %s355_s27, [#allocation4]  }
  0xd2   :  { %419 = dma.done.wait [#allocation4], 32  }
  0xd3   :  { %420 = vsyncadd [#allocation4], 4294967264 }
  0xd4   :  { %362 = vsyncpa [#allocation3], 1 }
  0xd5   :  { %363 = vsyncpa [#allocation4], 1 }

</bundles_post_ra>
